<compile_context>
chip_gen: v6e
topology: v6e:2x2x1
jax: 0.10.0
libtpu: 0.0.40
codegen_flags: <defaults>
</compile_context>

<pallas_src>
import functools
import math

import jax
import jax.numpy as jnp
from jax import lax
from jax.experimental import pallas as pl
from jax.experimental.pallas import tpu as pltpu

EPS = 1e-7

# Rows of the (M, 128) flat view processed per grid step.
#   4096 * 128 * 4 B = 2 MiB per input per buffer -> ~8 MiB pipeline VMEM (f32),
#   comfortably inside the default scoped VMEM limit on v5e/v6e/v7x.
DEFAULT_BLOCK_ROWS = 4096


def _round_up(x, m):
    return ((x + m - 1) // m) * m


def _num_tensorcores():
    """2 on multi-TensorCore chips (v4 / v5p / v7-class), else 1 (v5e / v6e)."""
    try:
        kind = jax.devices()[0].device_kind.lower()
    except Exception:  # pragma: no cover - defensive
        return 1
    return 2 if any(tag in kind for tag in ("v4", "v5p", "v7")) else 1


def _nwd_kernel(pred_ref, tgt_ref, out_ref, acc_ref, *,
                d, eps, m_rows, block_rows, tiles_per_core):
    """One (block_rows, 128) lane-dense tile; each D-lane group is one box."""
    c = pl.program_id(0)
    i = pl.program_id(1)

    @pl.when(i == 0)
    def _init():
        acc_ref[...] = jnp.zeros_like(acc_ref)

    p = pred_ref[...].astype(jnp.float32)            # (R, 128)
    t = tgt_ref[...].astype(jnp.float32)             # (R, 128)

    lane = lax.broadcasted_iota(jnp.int32, (1, 128), 1)
    j = lane % d                                     # element index inside each box

    # ---- per-box reductions via an XLU lane-roll tree (within D-lane groups) ----
    diff = p - t
    sq = diff * diff                                 # squared elementwise distance
    tsig = jnp.where(j >= d // 2, t, 0.0)            # keep only target-sigma lanes

    s = d // 2
    while s >= 1:
        sq = sq + pltpu.roll(sq, s, 1)
        tsig = tsig + pltpu.roll(tsig, s, 1)
        s //= 2

    # The rotate direction decides whether the full in-group sum lands in lane 0
    # or lane d-1 of each group.  Probe it with a rolled iota (direction-proof).
    probe = pltpu.roll(lane, 1, 1)
    probe0 = jnp.sum(jnp.where(lane == 0, probe, 0))         # == probe[0, 0]
    sum_lane = jnp.where(probe0 == 127, d - 1, 0)

    # ---- NWD per box (values only valid at lane `sum_lane` of each group) ----
    w_dist = sq                                              # sum over all d elems
    norm = (10.0 / d) * tsig + 5.0 * eps                     # 5*(mean(t_sigma)+eps)
    nwd = 1.0 - jnp.exp(-jnp.sqrt(w_dist) / norm)

    # ---- mask: one result lane per box, only rows inside the real array ----
    b = c * tiles_per_core + i                               # logical tile index
    row = lax.broadcasted_iota(jnp.int32, (block_rows, 1), 0)
    valid = (j == sum_lane) & (b * block_rows + row < m_rows)
    acc_ref[...] += jnp.sum(jnp.where(valid, nwd, 0.0), axis=0, keepdims=True)

    @pl.when(i == pl.num_programs(1) - 1)
    def _finalize():
        rows8 = lax.broadcasted_iota(jnp.int32, out_ref.shape, 0)
        out_ref[...] = jnp.where(rows8 == 0, acc_ref[...], 0.0)


def nwd_loss(pred, target, eps=EPS, block_rows=DEFAULT_BLOCK_ROWS):
    """pred, target: arrays of shape (..., D). Returns the scalar NWD loss (f32)."""
    assert pred.shape == target.shape
    d = pred.shape[-1]
    assert d % 2 == 0 and (d & (d - 1)) == 0 and 2 <= d <= 128, (
        "Pallas NWD path needs the descriptor size D to be a power of two <= 128")

    n = math.prod(pred.shape[:-1]) if pred.ndim > 1 else 1
    total = n * d

    flat_p = pred.reshape(-1)
    flat_t = target.reshape(-1)

    lpad = _round_up(total, 128)
    if lpad != total:
        # Only hit when N*D % 128 != 0; zero boxes are exactly neutral (nwd == 0,
        # requires eps > 0).  Costs one copy of each input in that case.
        flat_p = jnp.pad(flat_p, (0, lpad - total))
        flat_t = jnp.pad(flat_t, (0, lpad - total))
    m_rows = lpad // 128

    pm = flat_p.reshape(m_rows, 128)       # free row-major metadata reshape
    tm = flat_t.reshape(m_rows, 128)

    r = _round_up(min(block_rows, _round_up(m_rows, 8)), 8)
    num_tiles = pl.cdiv(m_rows, r)
    num_cores = _num_tensorcores()
    tiles_per_core = pl.cdiv(num_tiles, num_cores)

    kernel = functools.partial(
        _nwd_kernel, d=d, eps=float(eps), m_rows=m_rows, block_rows=r,
        tiles_per_core=tiles_per_core)

    def in_map(c, i):
        # Clamp redundant trailing steps (only possible on the 2nd core when the
        # tile count is odd/small); their contribution is masked to zero in-kernel.
        return (jnp.minimum(c * tiles_per_core + i, num_tiles - 1), 0)

    partials = pl.pallas_call(
        kernel,
        out_shape=jax.ShapeDtypeStruct((num_cores * 8, 128), jnp.float32),
        grid_spec=pltpu.PrefetchScalarGridSpec(
            num_scalar_prefetch=0,
            grid=(num_cores, tiles_per_core),
            in_specs=[
                pl.BlockSpec((r, 128), in_map),
                pl.BlockSpec((r, 128), in_map),
            ],
            out_specs=pl.BlockSpec((8, 128), lambda c, i: (c, 0)),
            scratch_shapes=[pltpu.VMEM((1, 128), jnp.float32)],
        ),
        compiler_params=pltpu.CompilerParams(
            dimension_semantics=("parallel", "arbitrary"),
        ),
    )(pm, tm)

    # Only row 0 of each per-core slab is nonzero; divide by the true box count.
    return jnp.sum(partials) / jnp.float32(n)


def nwd_loss_ref(pred, target, eps=EPS):
    """Pure-JAX reference mirroring the PyTorch module."""
    d = pred.shape[-1]
    half = d // 2
    pred = pred.astype(jnp.float32)
    target = target.astype(jnp.float32)
    pred_mean, pred_sigma = pred[..., :half], pred[..., half:]
    target_mean, target_sigma = target[..., :half], target[..., half:]
    mean_distance = jnp.sum((pred_mean - target_mean) ** 2, axis=-1)
    sigma_distance = jnp.sum((pred_sigma - target_sigma) ** 2, axis=-1)
    w_dist = mean_distance + sigma_distance
    norm_factor = 5.0 * (jnp.mean(target_sigma, axis=-1) + eps)
    nwd = 1.0 - jnp.exp(-jnp.sqrt(w_dist) / norm_factor)
    return jnp.mean(nwd)


if __name__ == "__main__":
    key = jax.random.PRNGKey(0)
    k1, k2 = jax.random.split(key)

    # batch=2, 64 boxes, descriptor size 8 (4 mean + 4 sigma)
    B, A, D = 2, 64, 8
    pred = jax.random.uniform(k1, (B, A, D), dtype=jnp.float32) * 4.0
    target = jax.random.uniform(k2, (B, A, D), dtype=jnp.float32) * 4.0 + 0.1

    loss_fn = jax.jit(nwd_loss)
    out = loss_fn(pred, target)
    out = jax.block_until_ready(out)

    ref = nwd_loss_ref(pred, target)
    assert jnp.allclose(out, ref, rtol=1e-5, atol=1e-6), (out, ref)

    print("KERNEL_OK")
</pallas_src>

<mosaic_0001>
module attributes {stable_mosaic.version = 11 : i64} {
  func.func @_nwd_kernel(%arg0: i32, %arg1: i32, %arg2: memref<8x128xf32, #tpu.memory_space<vmem>>, %arg3: memref<8x128xf32, #tpu.memory_space<vmem>>, %arg4: memref<8x128xf32, #tpu.memory_space<vmem>>, %arg5: memref<1x128xf32, #tpu.memory_space<vmem>>) attributes {dimension_semantics = [#tpu.dimension_semantics<parallel>, #tpu.dimension_semantics<arbitrary>], iteration_bounds = array<i64: 1, 1>, scalar_prefetch = 0 : i64, scratch_operands = 1 : i64, tpu.core_type = #tpu.core_type<tc>, window_params = [{transform_indices = @transform_0, window_bounds = array<i64: 8, 128>}, {transform_indices = @transform_1, window_bounds = array<i64: 8, 128>}, {transform_indices = @transform_2, window_bounds = array<i64: 8, 128>}]} {
    %c0_i32 = arith.constant 0 : i32
    %0 = arith.cmpi eq, %arg1, %c0_i32 : i32
    %1 = arith.extui %0 : i1 to i32
    %c0_i32_0 = arith.constant 0 : i32
    %2 = arith.cmpi ne, %1, %c0_i32_0 : i32
    scf.if %2 {
      %cst_33 = arith.constant 0.000000e+00 : f32
      %87 = vector.broadcast %cst_33 : f32 to vector<1x128xf32>
      %c0_34 = arith.constant 0 : index
      %c0_35 = arith.constant 0 : index
      %88 = vector.load %arg5[%c0_34, %c0_35] : memref<1x128xf32, #tpu.memory_space<vmem>>, vector<1x128xf32>
      tpu.vector_store %arg5[%c0_34, %c0_35], %87 {strides = array<i32>} : memref<1x128xf32, #tpu.memory_space<vmem>>, vector<1x128xf32>,
    } else {
    }
    %c0 = arith.constant 0 : index
    %c0_1 = arith.constant 0 : index
    %3 = vector.load %arg2[%c0, %c0_1] : memref<8x128xf32, #tpu.memory_space<vmem>>, vector<8x128xf32>
    %c0_2 = arith.constant 0 : index
    %c0_3 = arith.constant 0 : index
    %4 = vector.load %arg3[%c0_2, %c0_3] : memref<8x128xf32, #tpu.memory_space<vmem>>, vector<8x128xf32>
    %5 = tpu.iota {dimensions = array<i32: 1>} : vector<1x128xi32>
    %c8_i32 = arith.constant 8 : i32
    %c0_i32_4 = arith.constant 0 : i32
    %6 = arith.cmpi eq, %c8_i32, %c0_i32_4 : i32
    %c1_i32 = arith.constant 1 : i32
    %7 = arith.select %6, %c1_i32, %c8_i32 : i32
    %8 = vector.broadcast %7 : i32 to vector<1x128xi32>
    %9 = arith.remsi %5, %8 : vector<1x128xi32>
    %c0_i32_5 = arith.constant 0 : i32
    %10 = vector.broadcast %c0_i32_5 : i32 to vector<1x128xi32>
    %11 = arith.cmpi ne, %9, %10 : vector<1x128xi32>
    %c0_i32_6 = arith.constant 0 : i32
    %12 = vector.broadcast %c0_i32_6 : i32 to vector<1x128xi32>
    %13 = arith.cmpi slt, %9, %12 : vector<1x128xi32>
    %c0_i32_7 = arith.constant 0 : i32
    %14 = arith.cmpi slt, %7, %c0_i32_7 : i32
    %15 = vector.broadcast %14 : i1 to vector<1x128xi1>
    %16 = vector.broadcast %15 : vector<1x128xi1> to vector<1x128xi1>
    %17 = arith.xori %13, %16 : vector<1x128xi1>
    %18 = arith.andi %17, %11 : vector<1x128xi1>
    %19 = vector.broadcast %7 : i32 to vector<1x128xi32>
    %20 = arith.addi %9, %19 : vector<1x128xi32>
    %21 = arith.select %18, %20, %9 : vector<1x128xi1>, vector<1x128xi32>
    %22 = arith.subf %3, %4 : vector<8x128xf32>
    %23 = arith.mulf %22, %22 : vector<8x128xf32>
    %c4_i32 = arith.constant 4 : i32
    %24 = vector.broadcast %c4_i32 : i32 to vector<1x128xi32>
    %25 = arith.cmpi sge, %21, %24 : vector<1x128xi32>
    %cst = arith.constant 0.000000e+00 : f32
    %26 = vector.shape_cast %25 : vector<1x128xi1> to vector<1x128xi1>
    %27 = vector.broadcast %26 : vector<1x128xi1> to vector<8x128xi1>
    %28 = vector.broadcast %cst : f32 to vector<8x128xf32>
    %29 = arith.select %27, %4, %28 : vector<8x128xi1>, vector<8x128xf32>
    %c4_i32_8 = arith.constant 4 : i32
    %30 = tpu.dynamic_rotate %23 by %c4_i32_8 dim 1 : vector<8x128xf32>, i32 -> vector<8x128xf32>
    %31 = arith.addf %23, %30 : vector<8x128xf32>
    %c4_i32_9 = arith.constant 4 : i32
    %32 = tpu.dynamic_rotate %29 by %c4_i32_9 dim 1 : vector<8x128xf32>, i32 -> vector<8x128xf32>
    %33 = arith.addf %29, %32 : vector<8x128xf32>
    %c2_i32 = arith.constant 2 : i32
    %34 = tpu.dynamic_rotate %31 by %c2_i32 dim 1 : vector<8x128xf32>, i32 -> vector<8x128xf32>
    %35 = arith.addf %31, %34 : vector<8x128xf32>
    %c2_i32_10 = arith.constant 2 : i32
    %36 = tpu.dynamic_rotate %33 by %c2_i32_10 dim 1 : vector<8x128xf32>, i32 -> vector<8x128xf32>
    %37 = arith.addf %33, %36 : vector<8x128xf32>
    %c1_i32_11 = arith.constant 1 : i32
    %38 = tpu.dynamic_rotate %35 by %c1_i32_11 dim 1 : vector<8x128xf32>, i32 -> vector<8x128xf32>
    %39 = arith.addf %35, %38 : vector<8x128xf32>
    %c1_i32_12 = arith.constant 1 : i32
    %40 = tpu.dynamic_rotate %37 by %c1_i32_12 dim 1 : vector<8x128xf32>, i32 -> vector<8x128xf32>
    %41 = arith.addf %37, %40 : vector<8x128xf32>
    %c1_i32_13 = arith.constant 1 : i32
    %42 = tpu.dynamic_rotate %5 by %c1_i32_13 dim 1 : vector<1x128xi32>, i32 -> vector<1x128xi32>
    %c0_i32_14 = arith.constant 0 : i32
    %43 = vector.broadcast %c0_i32_14 : i32 to vector<1x128xi32>
    %44 = arith.cmpi eq, %5, %43 : vector<1x128xi32>
    %c0_i32_15 = arith.constant 0 : i32
    %45 = vector.broadcast %c0_i32_15 : i32 to vector<1x128xi32>
    %46 = arith.select %44, %42, %45 : vector<1x128xi1>, vector<1x128xi32>
    %47 = vector.shape_cast %46 : vector<1x128xi32> to vector<1x1x128xi32>
    %cst_16 = arith.constant dense<0> : vector<1xi32>
    %48 = vector.multi_reduction <add>, %47, %cst_16 [1, 2] : vector<1x1x128xi32> to vector<1xi32>
    %49 = vector.shape_cast %48 : vector<1xi32> to vector<1x1x1xi32>
    %50 = vector.extract %49[0, 0, 0] : i32 from vector<1x1x1xi32>
    %c127_i32 = arith.constant 127 : i32
    %51 = arith.cmpi eq, %50, %c127_i32 : i32
    %c7_i32 = arith.constant 7 : i32
    %c0_i32_17 = arith.constant 0 : i32
    %52 = arith.select %51, %c7_i32, %c0_i32_17 : i32
    %cst_18 = arith.constant 1.250000e+00 : f32
    %53 = vector.broadcast %cst_18 : f32 to vector<8x128xf32>
    %54 = arith.mulf %53, %41 : vector<8x128xf32>
    %cst_19 = arith.constant 5.000000e-07 : f32
    %55 = vector.broadcast %cst_19 : f32 to vector<8x128xf32>
    %56 = arith.addf %54, %55 : vector<8x128xf32>
    %57 = math.sqrt %39 : vector<8x128xf32>
    %cst_20 = arith.constant 0.000000e+00 : f32
    %58 = vector.broadcast %cst_20 : f32 to vector<8x128xf32>
    %59 = arith.subf %58, %57 : vector<8x128xf32>
    %60 = arith.divf %59, %56 : vector<8x128xf32>
    %61 = math.exp %60 : vector<8x128xf32>
    %cst_21 = arith.constant 1.000000e+00 : f32
    %62 = vector.broadcast %cst_21 : f32 to vector<8x128xf32>
    %63 = arith.subf %62, %61 : vector<8x128xf32>
    %c1_i32_22 = arith.constant 1 : i32
    %64 = arith.muli %arg0, %c1_i32_22 : i32
    %65 = arith.addi %64, %arg1 : i32
    %66 = tpu.iota {dimensions = array<i32: 0>} : vector<8x1xi32>
    %67 = vector.broadcast %52 : i32 to vector<1x128xi32>
    %68 = arith.cmpi eq, %21, %67 : vector<1x128xi32>
    %c8_i32_23 = arith.constant 8 : i32
    %69 = arith.muli %65, %c8_i32_23 : i32
    %70 = vector.broadcast %69 : i32 to vector<8x1xi32>
    %71 = arith.addi %70, %66 : vector<8x1xi32>
    %c8_i32_24 = arith.constant 8 : i32
    %72 = vector.broadcast %c8_i32_24 : i32 to vector<8x1xi32>
    %73 = arith.cmpi slt, %71, %72 : vector<8x1xi32>
    %74 = vector.broadcast %68 : vector<1x128xi1> to vector<8x128xi1>
    %75 = vector.broadcast %73 : vector<8x1xi1> to vector<8x128xi1>
    %76 = arith.andi %74, %75 : vector<8x128xi1>
    %c0_25 = arith.constant 0 : index
    %c0_26 = arith.constant 0 : index
    %77 = vector.load %arg5[%c0_25, %c0_26] : memref<1x128xf32, #tpu.memory_space<vmem>>, vector<1x128xf32>
    %cst_27 = arith.constant 0.000000e+00 : f32
    %78 = vector.broadcast %cst_27 : f32 to vector<8x128xf32>
    %79 = arith.select %76, %63, %78 : vector<8x128xi1>, vector<8x128xf32>
    %cst_28 = arith.constant dense<0.000000e+00> : vector<128xf32>
    %80 = vector.multi_reduction <add>, %79, %cst_28 [0] : vector<8x128xf32> to vector<128xf32>
    %81 = vector.shape_cast %80 : vector<128xf32> to vector<1x128xf32>
    %82 = arith.addf %77, %81 : vector<1x128xf32>
    %c0_29 = arith.constant 0 : index
    %c0_30 = arith.constant 0 : index
    %83 = vector.load %arg5[%c0_29, %c0_30] : memref<1x128xf32, #tpu.memory_space<vmem>>, vector<1x128xf32>
    tpu.vector_store %arg5[%c0_29, %c0_30], %82 {strides = array<i32>} : memref<1x128xf32, #tpu.memory_space<vmem>>, vector<1x128xf32>,
    %c0_i32_31 = arith.constant 0 : i32
    %84 = arith.cmpi eq, %arg1, %c0_i32_31 : i32
    %85 = arith.extui %84 : i1 to i32
    %c0_i32_32 = arith.constant 0 : i32
    %86 = arith.cmpi ne, %85, %c0_i32_32 : i32
    scf.if %86 {
      %87 = tpu.iota {dimensions = array<i32: 0>} : vector<8x128xi32>
      %c0_i32_33 = arith.constant 0 : i32
      %88 = vector.broadcast %c0_i32_33 : i32 to vector<8x128xi32>
      %89 = arith.cmpi eq, %87, %88 : vector<8x128xi32>
      %c0_34 = arith.constant 0 : index
      %c0_35 = arith.constant 0 : index
      %90 = vector.load %arg5[%c0_34, %c0_35] : memref<1x128xf32, #tpu.memory_space<vmem>>, vector<1x128xf32>
      %cst_36 = arith.constant 0.000000e+00 : f32
      %91 = vector.shape_cast %90 : vector<1x128xf32> to vector<1x128xf32>
      %92 = vector.broadcast %91 : vector<1x128xf32> to vector<8x128xf32>
      %93 = vector.broadcast %cst_36 : f32 to vector<8x128xf32>
      %94 = arith.select %89, %92, %93 : vector<8x128xi1>, vector<8x128xf32>
      %c0_37 = arith.constant 0 : index
      %c0_38 = arith.constant 0 : index
      %95 = vector.load %arg4[%c0_37, %c0_38] : memref<8x128xf32, #tpu.memory_space<vmem>>, vector<8x128xf32>
      tpu.vector_store %arg4[%c0_37, %c0_38], %94 {strides = array<i32>} : memref<8x128xf32, #tpu.memory_space<vmem>>, vector<8x128xf32>,
    } else {
    }
    return
  }
  func.func @transform_0(%arg0: i32, %arg1: i32) -> (i32, i32) {
    %c1_i32 = arith.constant 1 : i32
    %0 = arith.muli %arg0, %c1_i32 : i32
    %1 = arith.addi %0, %arg1 : i32
    %c0_i32 = arith.constant 0 : i32
    %2 = arith.minsi %1, %c0_i32 : i32
    %c0_i32_0 = arith.constant 0 : i32
    %c0_i32_1 = arith.constant 0 : i32
    return %2, %c0_i32_0 : i32, i32
  }
  func.func @transform_1(%arg0: i32, %arg1: i32) -> (i32, i32) {
    %c1_i32 = arith.constant 1 : i32
    %0 = arith.muli %arg0, %c1_i32 : i32
    %1 = arith.addi %0, %arg1 : i32
    %c0_i32 = arith.constant 0 : i32
    %2 = arith.minsi %1, %c0_i32 : i32
    %c0_i32_0 = arith.constant 0 : i32
    %c0_i32_1 = arith.constant 0 : i32
    return %2, %c0_i32_0 : i32, i32
  }
  func.func @transform_2(%arg0: i32, %arg1: i32) -> (i32, i32) {
    %c0_i32 = arith.constant 0 : i32
    %c0_i32_0 = arith.constant 0 : i32
    return %arg0, %c0_i32 : i32, i32
  }
}

</mosaic_0001>

<bundles_post_ra>
// kernel: nwd_loss.1
= control target key start
LH: loop header
LB: loop body
LE: loop exit
PB: predicated region body
PF: predicated region fallthrough
CT: control target
= control target key end

     0   :  { %v72_v0 = vlaneseq  ;;  %s218_s13 = smov 1   ;;  %s219_s14 = smov 4   ;;  %vm114_vm2 = vcmask 1040384   ;;  %v221_v21 = vmov 0.0   ;;  %s260_s0 = inlined_call_operand.vmem [shape: f32[8,128], index: 0, kind: input, shape index: {}]   ;;  %s261_s1 = inlined_call_operand.vmem [shape: f32[8,128], index: 1, kind: input, shape index: {}]   ;;  %s262_s2 = inlined_call_operand.vmem [shape: f32[8,128], index: 2, kind: output, shape index: {}]  }
   0x1   :  { %v70_v1 = vld [vmem:[%s260_s0] sm:$0xff]  ;;  %s220_s0 = smov 2   ;;  %69 = vst [vmem:[#allocation2] sm:$0x1] %v221_v21 }
   0x2   :  { %v71_v2 = vld [vmem:[%s261_s1] sm:$0xff]  ;;  %v244_v4 = vand.u32 127, %v72_v0  ;;  %v154_v63 = vshrl.u32 %v72_v0, 7 }
   0x3   :  { %v86_v3 = vsub.f32 %v70_v1, %v71_v2 }
   0x4   :  { %v78_v6 = vand.u32 7, %v244_v4  ;;  %110 = vrot.lane.b32.xlu1 %v244_v4, %s218_s13  ;;  %vm112_vm1 = vcmp.eq.s32.totalorder %v244_v4, 0  ;;  %vm179_vm6 = vcmp.eq.s32.totalorder %v154_v63, 0 }
   0x5   :  { %v87_v5 = vmul.f32 %v86_v3, %v86_v3 }
   0x6   :  { %vm88_vm0 = vcmp.ge.s32.totalorder %v78_v6, 4 }
   0x7   :  { %92 = vrot.lane.b32.xlu0 %v87_v5, %s219_s14  ;;  %v91_v7 = vsel %vm88_vm0, %v71_v2, 0.0 }
   0x8   :  { %v166_v60 = vld [vmem:[#allocation2] sm:$0x1] }
   0xb   :  { %95 = vrot.lane.b32.xlu0 %v91_v7, %s219_s14 }
  0x76   :  { %v111_v12 = vpop.permute.xlu1 %110 }
  0x77   :  { %v113_v13 = vsel %vm112_vm1, %v111_v12, 0 }
  0x78   :  { %v115_v14 = vsel %vm114_vm2, %v113_v13, 0 }
  0x79   :  { %v93_v8 = vpop.permute.xlu0 %92  ;;  %v116_v15 = vand.u32 65535, %v115_v14  ;;  %v117_v16 = vshrl.u32 %v115_v14, 16 }
  0x7a   :  { %v94_v9 = vadd.f32 %v93_v8, %v87_v5 }
  0x7b   :  { %v118_v17 = vcvt.s32.f32 %v116_v15  ;;  %v119_v18 = vcvt.s32.f32 %v117_v16 }
  0x7c   :  { %98 = vrot.lane.b32.xlu1 %v94_v9, %s220_s0 }
  0x7d   :  { %v96_v10 = vpop.permute.xlu0 %95 }
  0x7e   :  { %v97_v11 = vadd.f32 %v96_v10, %v91_v7 }
  0x80   :  { %101 = vrot.lane.b32.xlu0 %v97_v11, %s220_s0 }
  0x9f   :  { %120 = vadd.xlane.f32.xlu0 %v118_v17 }
  0xa0   :  { %122 = vadd.xlane.f32.xlu1 %v119_v18 }
  0xee   :  { %v99_v19 = vpop.permute.xlu1 %98 }
  0xef   :  { %v100_v20 = vadd.f32 %v99_v19, %v94_v9 }
  0xf1   :  { %104 = vrot.lane.b32.xlu0 %v100_v20, %s218_s13 }
  0xf2   :  { %v102_v22 = vpop.permute.xlu0 %101 }
  0xf3   :  { %v103_v23 = vadd.f32 %v102_v22, %v97_v11 }
  0xf5   :  { %107 = vrot.lane.b32.xlu1 %v103_v23, %s218_s13 }
 0x128   :  { %v121_v24 = vpop.xlane.xlu0 %120 }
 0x129   :  { %v123_v25 = vpop.xlane.xlu1 %122  ;;  %v124_v27 = vcvt.f32.s32 %v121_v24 }
 0x12a   :  { %v125_v26 = vcvt.f32.s32 %v123_v25 }
 0x12c   :  { %v126_v28 = vshll.u32 %v125_v26, 16 }
 0x12e   :  { %v127_v29 = vadd.s32 %v126_v28, %v124_v27 }
 0x130   :  { %v128_v30 = vrot.slane %v127_v29, 4 }
 0x132   :  { %v129_v31 = vadd.s32 %v128_v30, %v127_v29 }
 0x134   :  { %v130_v32 = vrot.slane %v129_v31, 2 }
 0x136   :  { %v131_v33 = vadd.s32 %v130_v32, %v129_v31 }
 0x138   :  { %v132_v34 = vrot.slane %v131_v33, 1 }
 0x13a   :  { %v133_v35 = vadd.s32 %v132_v34, %v131_v33 }
 0x13c   :  { %206 = vpush %v133_v35 }
 0x163   :  { %v105_v36 = vpop.permute.xlu0 %104 }
 0x164   :  { %v106_v37 = vadd.f32 %v105_v36, %v100_v20 }
 0x166   :  { %212 = vrsqrt.f32 %v106_v37  ;;  %vm141_vm3 = vcmp.eq.f32.partialorder %v106_v37, inf  ;;  %v144_v44 = vand.u32 2147483648, %v106_v37  ;;  %vm143_vm4 = vcmp.eq.f32.partialorder %v106_v37, 0.0 }
 0x167   :  { %v108_v38 = vpop.permute.xlu1 %107 }
 0x168   :  { %v109_v39 = vadd.f32 %v108_v38, %v103_v23 }
 0x16a   :  { %v137_v40 = vmul.f32 1.25, %v109_v39 }
 0x16c   :  { %v138_v41 = vadd.f32 5e-07, %v137_v40 }
 0x16d   :  { %s207_s1 = spop %206 }
 0x16e   :  { %214 = vrcp.f32 %v138_v41  ;;  %p135_p0 = scmp.eq.s32.totalorder %s207_s1, 127 }
 0x170   :  { %s136_s15 = scalar_select %p135_p0, 7, 0 }
 0x172   :  { %v155_v51 = vstv %s136_s15 }
 0x173   :  { %v213_v42 = vpop.eup %212  ;;  %vm156_vm5 = vcmp.eq.s32.totalorder %v78_v6, %v155_v51 }
 0x174   :  { %v140_v43 = vmul.f32 %v213_v42, %v106_v37 }
 0x176   :  { %v142_v45 = vsel %vm141_vm3, %v106_v37, %v140_v43 }
 0x177   :  { %v145_v46 = vsel %vm143_vm4, %v144_v44, %v142_v45 }
 0x178   :  { %v146_v47 = vsub.f32 0.0, %v145_v46 }
 0x17b   :  { %v215_v48 = vpop.eup %214 }
 0x17c   :  { %v148_v49 = vmul.f32 %v215_v48, %v146_v47 }
 0x17e   :  { %v149_v50 = vmul.f32 1.442695, %v148_v49 }
 0x180   :  { %216 = vpow2.f32 %v149_v50 }
 0x18d   :  { %v217_v52 = vpop.eup %216 }
 0x18e   :  { %v151_v53 = vsub.f32 1.0, %v217_v52 }
 0x190   :  { %v167_v54 = vsel %vm156_vm5, %v151_v53, 0.0 }
 0x191   :  { %v168_v55 = vrot.slane %v167_v54, 4 }
 0x193   :  { %v169_v56 = vadd.f32 %v168_v55, %v167_v54 }
 0x195   :  { %v170_v57 = vrot.slane %v169_v56, 2 }
 0x197   :  { %v171_v58 = vadd.f32 %v170_v57, %v169_v56 }
 0x199   :  { %v172_v59 = vrot.slane %v171_v58, 1 }
 0x19b   :  { %v173_v61 = vadd.f32 %v172_v59, %v171_v58 }
 0x19d   :  { %v174_v62 = vadd.f32 %v173_v61, %v166_v60 }
 0x19f   :  { %175 = vst [vmem:[#allocation2] sm:$0x1] %v174_v62 }
 0x1a6   :  { %v205_v1 = vld [vmem:[#allocation2] ss:$0 sm:$0xff] }
 0x1a7   :  { %v187_v2 = vsel %vm179_vm6, %v205_v1, 0.0 }
 0x1a8   :  { %188 = vst [vmem:[%s262_s2] sm:$0xff] %v187_v2 }

</bundles_post_ra>
